<compile_context>
chip_gen: v6e
topology: v6e:2x2x1
jax: 0.10.0
libtpu: 0.0.40
codegen_flags: <defaults>
</compile_context>

<pallas_src>
import jax
import jax.numpy as jnp
from jax import lax
from jax.experimental import pallas as pl
from jax.experimental.pallas import tpu as pltpu


def grad_saliency_kernel(x_ref, wt_ref, b_ref, out_ref):
    """One batch tile: forward logits, argmax, |d score / d x| writeback."""
    xv = x_ref[...]
    wv = wt_ref[...]                      # (K, D), VMEM-resident across the grid
    if xv.dtype != wv.dtype:              # x may arrive in bf16; promote in-register
        xv = xv.astype(wv.dtype)

    # ---- forward: logits[n, k] = sum_d x[n, d] * W^T[k, d] + b[k]  (MXU) ----
    logits = lax.dot_general(
        xv, wv,
        dimension_numbers=(((1,), (1,)), ((), ())),
        preferred_element_type=jnp.float32)
    logits = logits + b_ref[...].astype(jnp.float32)
    n, k = logits.shape

    # ---- y = argmax(logits, dim=1), first-occurrence tie-break (torch) ----
    # NOTE: NaN logits would make the one-hot all-zero (zero saliency) instead
    # of torch's arbitrary index; acceptable for finite inputs.
    max_val = jnp.max(logits, axis=1, keepdims=True)
    iota_k = lax.broadcasted_iota(jnp.int32, (n, k), 1)
    y = jnp.min(jnp.where(logits == max_val, iota_k, k), axis=1, keepdims=True)

    # ---- backward: d(logits[n, y_n]) / d x[n, :] = W^T[y_n, :] ----
    # saliency = |onehot(y) @ W^T|  (MXU gather + 1 VPU abs per output elem;
    # hidden under the HBM-bound output write, so no separate |W|^T is needed).
    onehot = (iota_k == y).astype(wv.dtype)
    grad = jnp.dot(onehot, wv, preferred_element_type=jnp.float32)
    out_ref[...] = jnp.abs(grad).astype(out_ref.dtype)


def _usable_vmem_budget():
    """Per-core VMEM bytes we plan against, with headroom for Mosaic scratch."""
    cap = 64 * 1024 * 1024                       # conservative fallback (all gens)
    try:
        cap = int(pltpu.get_tpu_info().vmem_capacity_bytes)
    except Exception:
        pass
    # ~112 MiB usable on 128-MiB parts (v5e/v6e), ~52 MiB on 64-MiB parts (v7x).
    return cap - max(cap // 8, 12 * 1024 * 1024)


def _run_pallas(x2d, wt, b2, *, tile_n, out_dtype, vmem_bytes, cost,
                single_buffer_weights):
    n_pad, d = x2d.shape
    k = wt.shape[0]
    weight_kwargs = {}
    if single_buffer_weights:
        # Constant index_map -> block never changes; one buffer is enough.
        weight_kwargs = dict(pipeline_mode=pl.Buffered(1))
    return pl.pallas_call(
        grad_saliency_kernel,
        out_shape=jax.ShapeDtypeStruct((n_pad, d), out_dtype),
        grid=(n_pad // tile_n,),
        in_specs=[
            pl.BlockSpec((tile_n, d), lambda i: (i, 0)),              # x: streamed
            pl.BlockSpec((k, d), lambda i: (0, 0), **weight_kwargs),  # W^T: resident
            pl.BlockSpec((1, k), lambda i: (0, 0), **weight_kwargs),  # b: resident
        ],
        out_specs=pl.BlockSpec((tile_n, d), lambda i: (i, 0)),
        compiler_params=pltpu.CompilerParams(
            dimension_semantics=("parallel",),     # megacore-shardable on v7x
            vmem_limit_bytes=int(vmem_bytes),
        ),
        cost_estimate=cost,
    )(x2d, wt, b2)


def grad_saliency(x_nchw, w, b, *, use_bf16_matmul=False,
                  out_dtype=jnp.float32, max_tile_n=1024):
    """GRAD(model).forward(x) with model = linear classifier (W, b).

    x_nchw: (N, C, H, W);  w: (D, K) with D = C*H*W;  b: (K,).
    Returns |d logits[n, argmax_n] / d x| with shape (N, C, H, W).
    """
    N, C, H, Wd = x_nchw.shape
    D = C * H * Wd
    K = w.shape[1]

    # ---- dtypes: keep x's width (bf16 stays bf16); optional bf16 matmul ----
    if use_bf16_matmul:
        x_dtype, w_dtype = jnp.bfloat16, jnp.bfloat16
    else:
        if x_nchw.dtype in (jnp.dtype(jnp.bfloat16), jnp.dtype(jnp.float32)):
            x_dtype = x_nchw.dtype
        else:
            x_dtype = jnp.float32
        w_dtype = jnp.float32

    x_flat = x_nchw.reshape(N, D).astype(x_dtype)
    wt = jnp.transpose(w).astype(w_dtype)        # (K, D): the single resident weight
    b2 = b.reshape(1, K).astype(jnp.float32)

    x_item = jnp.dtype(x_dtype).itemsize
    w_item = jnp.dtype(w_dtype).itemsize
    out_item = jnp.dtype(out_dtype).itemsize

    # ---- batch tile: grow from the generation-aware VMEM budget ----
    budget = _usable_vmem_budget()
    resident = 2 * (K * D * w_item + 128 * 4)    # W^T + b (worst case: 2 buffers each)
    # per-batch-row streaming bytes: x + out (double-buffered) plus one f32
    # intermediate for the gathered-gradient tile before the abs/store.
    row_bytes = D * (2 * x_item + 2 * out_item + 4)
    slack = 4 * 1024 * 1024
    avail = budget - resident - slack
    if avail < 8 * row_bytes:
        # TODO(synk): add an innermost "arbitrary" feature-chunk grid axis with a
        # logits accumulator (two-phase: accumulate logits over D chunks, then
        # gather |W^T[y]| per chunk) so realistic classifier sizes (huge K*D)
        # stop requiring full VMEM residency of W^T.
        raise ValueError("W^T does not fit the VMEM residency budget; a "
                         "feature-chunked kernel variant is required for this size.")
    tile_n = min(max_tile_n, avail // row_bytes)

    # Clamp to the (8-aligned) batch; keep >= 2 grid steps when the batch allows
    # it so dimension_semantics=("parallel",) can use both TensorCores on v7x.
    n_ceil8 = 8 * ((N + 7) // 8)
    cap = n_ceil8
    if n_ceil8 >= 16:
        cap = min(cap, 8 * (((N + 1) // 2 + 7) // 8))
    tile_n = max(8, min((int(tile_n) // 8) * 8, cap))

    n_pad = pl.cdiv(N, tile_n) * tile_n
    if n_pad != N:
        x_flat = jnp.pad(x_flat, ((0, n_pad - N), (0, 0)))

    cost = pl.CostEstimate(
        flops=4 * n_pad * D * K,                 # forward + gradient-gather matmuls
        transcendentals=0,
        bytes_accessed=n_pad * D * (x_item + out_item) + K * D * w_item + K * 4,
    )

    try:
        out = _run_pallas(x_flat, wt, b2, tile_n=tile_n, out_dtype=out_dtype,
                          vmem_bytes=budget, cost=cost, single_buffer_weights=True)
    except Exception:
        # pl.Buffered(1) not accepted by this jax/Mosaic build: fall back to the
        # default pipelining of the (small) constant-index weight blocks.
        out = _run_pallas(x_flat, wt, b2, tile_n=tile_n, out_dtype=out_dtype,
                          vmem_bytes=budget, cost=cost, single_buffer_weights=False)

    if n_pad != N:
        out = out[:N]
    # unsqueeze(1) + max(dim=1) in the torch module is a shape no-op.
    return out.reshape(N, C, H, Wd)


if __name__ == "__main__":
    key = jax.random.PRNGKey(0)
    N, C, H, W = 2, 4, 16, 16
    K = 8                      # number of classes of the wrapped model
    D = C * H * W

    kx, kw, kb = jax.random.split(key, 3)
    x = jax.random.normal(kx, (N, C, H, W), dtype=jnp.float32)
    w = jax.random.normal(kw, (D, K), dtype=jnp.float32) * 0.05   # model weight
    b = jax.random.normal(kb, (K,), dtype=jnp.float32) * 0.01     # model bias

    sal = grad_saliency(x, w, b)
    sal = jax.block_until_ready(sal)

    # pure-JAX autodiff reference (same semantics as GRAD.forward with y=None)
    def model(xx):
        return xx.reshape(xx.shape[0], -1) @ w + b

    logits = model(x)
    y = jnp.argmax(logits, axis=1)
    ref_grad = jax.grad(lambda xx: jnp.sum(model(xx)[jnp.arange(N), y]))(x)
    ref = jnp.abs(ref_grad)

    assert sal.shape == (N, C, H, W)
    assert jnp.allclose(sal, ref, atol=1e-5), "saliency mismatch vs autodiff reference"
    print("KERNEL_OK")
</pallas_src>

<mosaic_0001>
module attributes {stable_mosaic.version = 11 : i64} {
  func.func @grad_saliency_kernel(%arg0: i32, %arg1: memref<8x1024xf32, #tpu.memory_space<vmem>>, %arg2: memref<8x1024xf32, #tpu.memory_space<vmem>>, %arg3: memref<1x8xf32, #tpu.memory_space<vmem>>, %arg4: memref<8x1024xf32, #tpu.memory_space<vmem>>) attributes {dimension_semantics = [#tpu.dimension_semantics<parallel>], iteration_bounds = array<i64: 1>, scalar_prefetch = 0 : i64, scratch_operands = 0 : i64, tpu.core_type = #tpu.core_type<tc>, window_params = [{transform_indices = @transform_0, window_bounds = array<i64: 8, 1024>}, {pipeline_mode = #tpu.pipeline_mode<synchronous>, transform_indices = @transform_1, window_bounds = array<i64: 8, 1024>}, {pipeline_mode = #tpu.pipeline_mode<synchronous>, transform_indices = @transform_2, window_bounds = array<i64: 1, 8>}, {transform_indices = @transform_3, window_bounds = array<i64: 8, 1024>}]} {
    %c0 = arith.constant 0 : index
    %c0_0 = arith.constant 0 : index
    %0 = vector.load %arg1[%c0, %c0_0] : memref<8x1024xf32, #tpu.memory_space<vmem>>, vector<8x1024xf32>
    %c0_1 = arith.constant 0 : index
    %c0_2 = arith.constant 0 : index
    %1 = vector.load %arg2[%c0_1, %c0_2] : memref<8x1024xf32, #tpu.memory_space<vmem>>, vector<8x1024xf32>
    %cst = arith.constant dense<0.000000e+00> : vector<8x8xf32>
    %2 = tpu.matmul %0, %1, %cst {dimension_numbers = #tpu.dot_dimension_numbers<[1], [1], [0], [0], [0, 0, 1, 0], [], []>} : vector<8x1024xf32>, vector<8x1024xf32>, vector<8x8xf32> -> vector<8x8xf32>
    %c0_3 = arith.constant 0 : index
    %c0_4 = arith.constant 0 : index
    %3 = vector.load %arg3[%c0_3, %c0_4] : memref<1x8xf32, #tpu.memory_space<vmem>>, vector<1x8xf32>
    %4 = vector.broadcast %3 : vector<1x8xf32> to vector<8x8xf32>
    %5 = arith.addf %2, %4 : vector<8x8xf32>
    %cst_5 = arith.constant dense<0xFF800000> : vector<8xf32>
    %6 = vector.multi_reduction <maximumf>, %5, %cst_5 [1] : vector<8x8xf32> to vector<8xf32>
    %7 = vector.shape_cast %6 : vector<8xf32> to vector<8x1xf32>
    %8 = tpu.iota {dimensions = array<i32: 1>} : vector<8x8xi32>
    %9 = vector.broadcast %7 : vector<8x1xf32> to vector<8x8xf32>
    %10 = arith.cmpf oeq, %5, %9 : vector<8x8xf32>
    %c8_i32 = arith.constant 8 : i32
    %11 = vector.broadcast %c8_i32 : i32 to vector<8x8xi32>
    %12 = arith.select %10, %8, %11 : vector<8x8xi1>, vector<8x8xi32>
    %cst_6 = arith.constant dense<2147483647> : vector<8xi32>
    %13 = vector.multi_reduction <minsi>, %12, %cst_6 [1] : vector<8x8xi32> to vector<8xi32>
    %14 = vector.shape_cast %13 : vector<8xi32> to vector<8x1xi32>
    %15 = vector.broadcast %14 : vector<8x1xi32> to vector<8x8xi32>
    %16 = arith.cmpi eq, %8, %15 : vector<8x8xi32>
    %17 = arith.extui %16 : vector<8x8xi1> to vector<8x8xi32>
    %18 = arith.sitofp %17 : vector<8x8xi32> to vector<8x8xf32>
    %cst_7 = arith.constant dense<0.000000e+00> : vector<8x1024xf32>
    %19 = tpu.matmul %18, %1, %cst_7 {dimension_numbers = #tpu.dot_dimension_numbers<[1], [0], [0], [1], [0, 0, 1, 1], [], []>} : vector<8x8xf32>, vector<8x1024xf32>, vector<8x1024xf32> -> vector<8x1024xf32>
    %20 = math.absf %19 : vector<8x1024xf32>
    %c0_8 = arith.constant 0 : index
    %c0_9 = arith.constant 0 : index
    %21 = vector.load %arg4[%c0_8, %c0_9] : memref<8x1024xf32, #tpu.memory_space<vmem>>, vector<8x1024xf32>
    tpu.vector_store %arg4[%c0_8, %c0_9], %20 {strides = array<i32>} : memref<8x1024xf32, #tpu.memory_space<vmem>>, vector<8x1024xf32>,
    return
  }
  func.func @transform_0(%arg0: i32) -> (i32, i32) {
    %c0_i32 = arith.constant 0 : i32
    %c0_i32_0 = arith.constant 0 : i32
    return %arg0, %c0_i32 : i32, i32
  }
  func.func @transform_1(%arg0: i32) -> (i32, i32) {
    %c0_i32 = arith.constant 0 : i32
    %c0_i32_0 = arith.constant 0 : i32
    %c0_i32_1 = arith.constant 0 : i32
    return %c0_i32, %c0_i32_0 : i32, i32
  }
  func.func @transform_2(%arg0: i32) -> (i32, i32) {
    %c0_i32 = arith.constant 0 : i32
    %c0_i32_0 = arith.constant 0 : i32
    %c0_i32_1 = arith.constant 0 : i32
    return %c0_i32, %c0_i32_0 : i32, i32
  }
  func.func @transform_3(%arg0: i32) -> (i32, i32) {
    %c0_i32 = arith.constant 0 : i32
    %c0_i32_0 = arith.constant 0 : i32
    return %arg0, %c0_i32 : i32, i32
  }
}

module attributes {stable_mosaic.version = 11 : i64} {
  func.func @grad_saliency_kernel(%arg0: i32, %arg1: memref<8x1024xf32, #tpu.memory_space<vmem>>, %arg2: memref<8x1024xf32, #tpu.memory_space<vmem>>, %arg3: memref<1x8xf32, #tpu.memory_space<vmem>>, %arg4: memref<8x1024xf32, #tpu.memory_space<vmem>>) attributes {dimension_semantics = [#tpu.dimension_semantics<parallel>], iteration_bounds = array<i64: 1>, scalar_prefetch = 0 : i64, scratch_operands = 0 : i64, tpu.core_type = #tpu.core_type<tc>, window_params = [{transform_indices = @transform_0, window_bounds = array<i64: 8, 1024>}, {pipeline_mode = #tpu.pipeline_mode<synchronous>, transform_indices = @transform_1, window_bounds = array<i64: 8, 1024>}, {pipeline_mode = #tpu.pipeline_mode<synchronous>, transform_indices = @transform_2, window_bounds = array<i64: 1, 8>}, {transform_indices = @transform_3, window_bounds = array<i64: 8, 1024>}]} {
    %c0 = arith.constant 0 : index
    %c0_0 = arith.constant 0 : index
    %0 = vector.load %arg1[%c0, %c0_0] : memref<8x1024xf32, #tpu.memory_space<vmem>>, vector<8x1024xf32>
    %c0_1 = arith.constant 0 : index
    %c0_2 = arith.constant 0 : index
    %1 = vector.load %arg2[%c0_1, %c0_2] : memref<8x1024xf32, #tpu.memory_space<vmem>>, vector<8x1024xf32>
    %cst = arith.constant dense<0.000000e+00> : vector<8x8xf32>
    %2 = tpu.matmul %0, %1, %cst {dimension_numbers = #tpu.dot_dimension_numbers<[1], [1], [0], [0], [0, 0, 1, 0], [], []>} : vector<8x1024xf32>, vector<8x1024xf32>, vector<8x8xf32> -> vector<8x8xf32>
    %c0_3 = arith.constant 0 : index
    %c0_4 = arith.constant 0 : index
    %3 = vector.load %arg3[%c0_3, %c0_4] : memref<1x8xf32, #tpu.memory_space<vmem>>, vector<1x8xf32>
    %4 = vector.broadcast %3 : vector<1x8xf32> to vector<8x8xf32>
    %5 = arith.addf %2, %4 : vector<8x8xf32>
    %cst_5 = arith.constant dense<0xFF800000> : vector<8xf32>
    %6 = vector.multi_reduction <maximumf>, %5, %cst_5 [1] : vector<8x8xf32> to vector<8xf32>
    %7 = vector.shape_cast %6 : vector<8xf32> to vector<8x1xf32>
    %8 = tpu.iota {dimensions = array<i32: 1>} : vector<8x8xi32>
    %9 = vector.broadcast %7 : vector<8x1xf32> to vector<8x8xf32>
    %10 = arith.cmpf oeq, %5, %9 : vector<8x8xf32>
    %c8_i32 = arith.constant 8 : i32
    %11 = vector.broadcast %c8_i32 : i32 to vector<8x8xi32>
    %12 = arith.select %10, %8, %11 : vector<8x8xi1>, vector<8x8xi32>
    %cst_6 = arith.constant dense<2147483647> : vector<8xi32>
    %13 = vector.multi_reduction <minsi>, %12, %cst_6 [1] : vector<8x8xi32> to vector<8xi32>
    %14 = vector.shape_cast %13 : vector<8xi32> to vector<8x1xi32>
    %15 = vector.broadcast %14 : vector<8x1xi32> to vector<8x8xi32>
    %16 = arith.cmpi eq, %8, %15 : vector<8x8xi32>
    %17 = arith.extui %16 : vector<8x8xi1> to vector<8x8xi32>
    %18 = arith.sitofp %17 : vector<8x8xi32> to vector<8x8xf32>
    %cst_7 = arith.constant dense<0.000000e+00> : vector<8x1024xf32>
    %19 = tpu.matmul %18, %1, %cst_7 {dimension_numbers = #tpu.dot_dimension_numbers<[1], [0], [0], [1], [0, 0, 1, 1], [], []>} : vector<8x8xf32>, vector<8x1024xf32>, vector<8x1024xf32> -> vector<8x1024xf32>
    %20 = math.absf %19 : vector<8x1024xf32>
    %c0_8 = arith.constant 0 : index
    %c0_9 = arith.constant 0 : index
    %21 = vector.load %arg4[%c0_8, %c0_9] : memref<8x1024xf32, #tpu.memory_space<vmem>>, vector<8x1024xf32>
    tpu.vector_store %arg4[%c0_8, %c0_9], %20 {strides = array<i32>} : memref<8x1024xf32, #tpu.memory_space<vmem>>, vector<8x1024xf32>,
    return
  }
  func.func @transform_0(%arg0: i32) -> (i32, i32) {
    %c0_i32 = arith.constant 0 : i32
    %c0_i32_0 = arith.constant 0 : i32
    return %arg0, %c0_i32 : i32, i32
  }
  func.func @transform_1(%arg0: i32) -> (i32, i32) {
    %c0_i32 = arith.constant 0 : i32
    %c0_i32_0 = arith.constant 0 : i32
    %c0_i32_1 = arith.constant 0 : i32
    return %c0_i32, %c0_i32_0 : i32, i32
  }
  func.func @transform_2(%arg0: i32) -> (i32, i32) {
    %c0_i32 = arith.constant 0 : i32
    %c0_i32_0 = arith.constant 0 : i32
    %c0_i32_1 = arith.constant 0 : i32
    return %c0_i32, %c0_i32_0 : i32, i32
  }
  func.func @transform_3(%arg0: i32) -> (i32, i32) {
    %c0_i32 = arith.constant 0 : i32
    %c0_i32_0 = arith.constant 0 : i32
    return %arg0, %c0_i32 : i32, i32
  }
}

</mosaic_0001>

<bundles_post_ra>
// kernel: tpu_custom_call.1
= control target key start
LH: loop header
LB: loop body
LE: loop exit
PB: predicated region body
PF: predicated region fallthrough
CT: control target
= control target key end

     0   :  { %8 = vsyncpa [#allocation3], 0  ;;  %s813_s0 = inlined_call_operand.hbm [shape: f32[8,1024], index: 0, kind: input, shape index: {}]   ;;  %s814_s1 = inlined_call_operand.hbm [shape: f32[8,1024], index: 1, kind: input, shape index: {}]   ;;  %s815_s2 = inlined_call_operand.vmem [shape: f32[1,8], index: 2, kind: input, shape index: {}]   ;;  %s816_s3 = inlined_call_operand.hbm [shape: f32[8,1024], index: 3, kind: output, shape index: {}]  }
   0x1   :  { %9 = vsyncpa [#allocation6], 0 }
   0x2   :  { %10 = vsyncpa [#allocation4], 0  ;;  %s763_s12 = smov [#allocation2]   ;;  %s764_s14 = smov [#allocation5]  }
   0x3   :  { %s17_s13 = sshll.u32 %s763_s12, 4  ;;  %s27_s15 = sshll.u32 %s764_s14, 4  ;;  %s18_s13 = int_to_ptr.vmem [resolvable:$true] %s17_s13  ;;  %s28_s15 = int_to_ptr.vmem [resolvable:$true] %s27_s15 }
   0x4   :  { %s705_s16 = scalar_lea.vmem %s18_s13, 1024  ;;  %p710_p1 = scmp.lt.s32.totalorder %s18_s13, %s18_s13 }
   0x5   :  { %p706_p0 = scmp.ne.s32.totalorder %s18_s13, %s705_s16  ;;  %p711_p2 = scmp.lt.s32.totalorder %s705_s16, %s705_s16 }
   0x7   :  { %p712_p3 = por %p711_p2, %p710_p1 }
   0x9   :  { %p713_p4 = pnand %p712_p3, %p706_p0 }
   0xb   :  { %716 = shalt.err (!%p713_p4)
}
   0xc   :  { %20 = dma.hbm_to_vmem [thread:$0]  %s813_s0, 1024, %s18_s13, [#allocation3]  }
   0xd   :  { %s725_s19 = scalar_lea.vmem %s28_s15, 1024  ;;  %p730_p6 = scmp.lt.s32.totalorder %s28_s15, %s28_s15 }
   0xe   :  { %p726_p5 = scmp.ne.s32.totalorder %s28_s15, %s725_s19  ;;  %p731_p7 = scmp.lt.s32.totalorder %s725_s19, %s725_s19 }
  0x10   :  { %p732_p8 = por %p731_p7, %p730_p6 }
  0x12   :  { %p733_p9 = pnand %p732_p8, %p726_p5 }
  0x14   :  { %736 = shalt.err (!%p733_p9)
}
  0x15   :  { %30 = dma.hbm_to_vmem [thread:$0]  %s814_s1, 1024, %s28_s15, [#allocation6]  }
  0x16   :  { %757 = dma.done.wait [#allocation3], 1024  }
  0x17   :  { %758 = vsyncadd [#allocation3], 4294966272 }
  0x18   :  { %759 = dma.done.wait [#allocation6], 1024  }
  0x19   :  { %760 = vsyncadd [#allocation6], 4294966272  ;;  %v48_v0 = vld [vmem:[#allocation5 + $0x8] sm:$0xff]  ;;  %v47_v1 = vld [vmem:[#allocation5] sm:$0xff]  ;;  %vm342_vm0 = vcmask 64512   ;;  %v346_v30 = vlaneseq  ;;  %v765_v37 = vmov 0.0  }
  0x1a   :  { %v50_v2 = vld [vmem:[#allocation5 + $0x18] sm:$0xff]  ;;  %92 = vmatprep.subr.mxu0 %v48_v0  ;;  %v49_v3 = vld [vmem:[#allocation5 + $0x10] sm:$0xff]  ;;  %v40_v4 = vld [vmem:[#allocation2 + $0x8] sm:$0xff] }
  0x1b   :  { %162 = vmatprep.subr.mxu1 %v50_v2  ;;  %v39_v5 = vld [vmem:[#allocation2] sm:$0xff]  ;;  %93 = vmatpush1.xpose.msra.mxu0 %v47_v1  ;;  %v42_v6 = vld [vmem:[#allocation2 + $0x18] sm:$0xff]  ;;  %v52_v7 = vld [vmem:[#allocation5 + $0x28] sm:$0xff]  ;;  %v347_v31 = vand.u32 127, %v346_v30 }
  0x1c   :  { %163 = vmatpush1.xpose.msra.mxu1 %v49_v3  ;;  %v41_v8 = vld [vmem:[#allocation2 + $0x10] sm:$0xff]  ;;  %126 = vmatprep.mubr.f32.mxu0 %v40_v4  ;;  %v793_v9 = vld [vmem:[#allocation5 + $0x20] sm:$0xff]  ;;  %v54_v10 = vld [vmem:[#allocation5 + $0x38] sm:$0xff] }
  0x1d   :  { %196 = vmatprep.mubr.f32.mxu1 %v42_v6  ;;  %v795_v11 = vld [vmem:[#allocation5 + $0x30] sm:$0xff]  ;;  %232 = vmatprep.subr.mxu0 %v52_v7  ;;  %v44_v12 = vld [vmem:[#allocation2 + $0x28] sm:$0xff]  ;;  %v46_v13 = vld [vmem:[#allocation2 + $0x38] sm:$0xff] }
  0x1e   :  { %302 = vmatprep.subr.mxu1 %v54_v10  ;;  %127 = vmatmul.mubr.f32.vlgmr.msra.gmra.mxu0 %v39_v5  ;;  %v43_v14 = vld [vmem:[#allocation2 + $0x20] sm:$0xff]  ;;  %v45_v15 = vld [vmem:[#allocation2 + $0x30] sm:$0xff] }
  0x1f   :  { %197 = vmatmul.mubr.f32.vlgmr.msra.gmra.mxu1 %v41_v8  ;;  %233 = vmatpush1.xpose.msra.mxu0 %v793_v9  ;;  %v687_v16 = vld [vmem:[%s815_s2] ss:$0 sm:$0xff]  ;;  %s766_s2 = smov [#allocation7]  }
  0x20   :  { %303 = vmatpush1.xpose.msra.mxu1 %v795_v11  ;;  %266 = vmatprep.mubr.f32.mxu0 %v44_v12  ;;  %s677_s22 = sshll.u32 %s766_s2, 4  ;;  %s678_s22 = int_to_ptr.vmem [resolvable:$true] %s677_s22 }
  0x21   :  { %336 = vmatprep.mubr.f32.mxu1 %v46_v13  ;;  %401 = vmatprep.subr.mxu0 %v48_v0  ;;  %s737_s23 = scalar_lea.vmem %s678_s22, 1024  ;;  %p742_p11 = scmp.lt.s32.totalorder %s678_s22, %s678_s22 }
  0x22   :  { %472 = vmatprep.subr.mxu1 %v50_v2  ;;  %267 = vmatmul.mubr.f32.vlgmr.msra.gmra.mxu0 %v43_v14  ;;  %p738_p10 = scmp.ne.s32.totalorder %s678_s22, %s737_s23  ;;  %p743_p12 = scmp.lt.s32.totalorder %s737_s23, %s737_s23 }
  0x23   :  { %337 = vmatmul.mubr.f32.vlgmr.msra.gmra.mxu1 %v45_v15  ;;  %402 = vmatpush1.msra.mxu0 %v47_v1 }
  0x24   :  { %473 = vmatpush1.msra.mxu1 %v49_v3  ;;  %543 = vmatprep.subr.mxu0 %v52_v7  ;;  %p744_p13 = por %p743_p12, %p742_p11 }
  0x25   :  { %614 = vmatprep.subr.mxu1 %v54_v10  ;;  %435 = vmatprep.mubr.f32.mxu0 %v765_v37 }
  0x26   :  { %506 = vmatprep.mubr.f32.mxu1 %v765_v37  ;;  %p745_p0 = pnand %p744_p13, %p738_p10 }
  0xde   :  { %v128_v17 = vpop.f32.mrf.mxu0 }
  0xdf   :  { %v198_v18 = vpop.f32.mrf.mxu1  ;;  %v129_v19 = vadd.f32 %v687_v16, %v128_v17 }
  0xe0   :  { %v130_v20 = vpop.f32.mrf.mxu0 }
  0xe1   :  { %v200_v21 = vpop.f32.mrf.mxu1  ;;  %v199_v22 = vadd.f32 %v198_v18, %v129_v19 }
  0xe2   :  { %v268_v23 = vpop.f32.mrf.mxu0 }
  0xe3   :  { %v338_v24 = vpop.f32.mrf.mxu1  ;;  %v269_v25 = vadd.f32 %v268_v23, %v199_v22 }
  0xe4   :  { %v270_v26 = vpop.f32.mrf.mxu0 }
  0xe5   :  { %v340_v27 = vpop.f32.mrf.mxu1  ;;  %v339_v28 = vadd.f32 %v338_v24, %v269_v25 }
  0xe7   :  { %v343_v29 = vsel %vm342_vm0, %v339_v28, -inf }
  0xe8   :  { %344 = vmax.xlane.f32.xlu0 %v343_v29 }
 0x171   :  { %v345_v32 = vpop.xlane.xlu0 %344 }
 0x172   :  { %vm348_vm1 = vcmp.eq.f32.partialorder %v339_v28, %v345_v32 }
 0x173   :  { %v349_v33 = vsel %vm348_vm1, %v347_v31, 8 }
 0x174   :  { %v350_v34 = vsel %vm342_vm0, %v349_v33, 2147483647 }
 0x175   :  { %v352_v35 = vshra.s32 %v350_v34, 16  ;;  %v351_v38 = vand.u32 65535, %v350_v34 }
 0x177   :  { %v354_v36 = vcvt.s32.f32 %v352_v35  ;;  %v353_v40 = vcvt.s32.f32 %v351_v38 }
 0x179   :  { %355 = vmin.xlane.f32.xlu0 %v354_v36 }
 0x202   :  { %v356_v39 = vpop.xlane.xlu0 %355 }
 0x203   :  { %vm357_vm2 = vcmp.eq.f32.partialorder %v354_v36, %v356_v39  ;;  %v362_v42 = vcvt.f32.s32 %v356_v39 }
 0x204   :  { %v358_v41 = vsel %vm357_vm2, %v353_v40, inf }
 0x205   :  { %359 = vmin.xlane.f32.xlu1 %v358_v41  ;;  %v363_v44 = vshll.u32 %v362_v42, 16 }
 0x28e   :  { %v360_v43 = vpop.xlane.xlu1 %359 }
 0x28f   :  { %v361_v45 = vcvt.f32.s32 %v360_v43 }
 0x291   :  { %v364_v46 = vadd.s32 %v363_v44, %v361_v45 }
 0x293   :  { %vm365_vm3 = vcmp.eq.s32.totalorder %v347_v31, %v364_v46 }
 0x294   :  { %v688_v47 = vsel %vm365_vm3, 1.0, %v765_v37 }
 0x295   :  { %689 = vmatmul.mubr.msk.f32.vlgmr.msra.gmra.mxu0 %vm342_vm0, %v688_v47  ;;  %690 = vmatmul.mubr.msk.f32.vlgmr.msra.gmra.mxu1 %vm342_vm0, %v688_v47 }
 0x296   :  { %544 = vmatpush1.msra.mxu0 %v793_v9  ;;  %615 = vmatpush1.msra.mxu1 %v795_v11 }
 0x297   :  { %577 = vmatprep.mubr.f32.mxu0 %v765_v37  ;;  %648 = vmatprep.mubr.f32.mxu1 %v765_v37 }
 0x299   :  { %691 = vmatmul.mubr.msk.f32.vlgmr.msra.gmra.mxu0 %vm342_vm0, %v688_v47  ;;  %692 = vmatmul.mubr.msk.f32.vlgmr.msra.gmra.mxu1 %vm342_vm0, %v688_v47 }
 0x355   :  { %v437_v48 = vpop.f32.mrf.mxu0  ;;  %v508_v49 = vpop.f32.mrf.mxu1 }
 0x356   :  { %v655_v50 = vand.u32 2147483647, %v437_v48  ;;  %v657_v51 = vand.u32 2147483647, %v508_v49 }
 0x357   :  { %v439_v52 = vpop.f32.mrf.mxu0  ;;  %v510_v53 = vpop.f32.mrf.mxu1 }
 0x358   :  { %663 = vst [vmem:[#allocation7] sm:$0xff] %v655_v50  ;;  %665 = vst [vmem:[#allocation7 + $0x10] sm:$0xff] %v657_v51  ;;  %v656_v54 = vand.u32 2147483647, %v439_v52  ;;  %v658_v55 = vand.u32 2147483647, %v510_v53 }
 0x359   :  { %v579_v56 = vpop.f32.mrf.mxu0  ;;  %v650_v57 = vpop.f32.mrf.mxu1 }
 0x35a   :  { %664 = vst [vmem:[#allocation7 + $0x8] sm:$0xff] %v656_v54  ;;  %666 = vst [vmem:[#allocation7 + $0x18] sm:$0xff] %v658_v55  ;;  %v659_v58 = vand.u32 2147483647, %v579_v56  ;;  %v661_v59 = vand.u32 2147483647, %v650_v57 }
 0x35b   :  { %v581_v60 = vpop.f32.mrf.mxu0  ;;  %v652_v61 = vpop.f32.mrf.mxu1 }
 0x35c   :  { %667 = vst [vmem:[#allocation7 + $0x20] sm:$0xff] %v659_v58  ;;  %669 = vst [vmem:[#allocation7 + $0x30] sm:$0xff] %v661_v59  ;;  %v660_v62 = vand.u32 2147483647, %v581_v60  ;;  %v662_v63 = vand.u32 2147483647, %v652_v61 }
 0x35e   :  { %668 = vst [vmem:[#allocation7 + $0x28] sm:$0xff] %v660_v62  ;;  %670 = vst [vmem:[#allocation7 + $0x38] sm:$0xff] %v662_v63 }
 0x35f   :  { %748 = shalt.err (!%p745_p0)
}
 0x360   :  { %680 = dma.vmem_to_hbm [thread:$0]  %s678_s22, 1024, %s816_s3, [#allocation4]  }
 0x361   :  { %761 = dma.done.wait [#allocation4], 1024  }
 0x362   :  { %762 = vsyncadd [#allocation4], 4294966272 }
 0x363   :  { %684 = vsyncpa [#allocation3], 1 }
 0x364   :  { %685 = vsyncpa [#allocation6], 1 }
 0x365   :  { %686 = vsyncpa [#allocation4], 1 }

// kernel: tpu_custom_call.1
= control target key start
LH: loop header
LB: loop body
LE: loop exit
PB: predicated region body
PF: predicated region fallthrough
CT: control target
= control target key end

     0   :  { %8 = vsyncpa [#allocation3], 0  ;;  %s813_s0 = inlined_call_operand.hbm [shape: f32[8,1024], index: 0, kind: input, shape index: {}]   ;;  %s814_s1 = inlined_call_operand.hbm [shape: f32[8,1024], index: 1, kind: input, shape index: {}]   ;;  %s815_s2 = inlined_call_operand.vmem [shape: f32[1,8], index: 2, kind: input, shape index: {}]   ;;  %s816_s3 = inlined_call_operand.hbm [shape: f32[8,1024], index: 3, kind: output, shape index: {}]  }
   0x1   :  { %9 = vsyncpa [#allocation6], 0 }
   0x2   :  { %10 = vsyncpa [#allocation4], 0  ;;  %s763_s12 = smov [#allocation2]   ;;  %s764_s14 = smov [#allocation5]  }
   0x3   :  { %s17_s13 = sshll.u32 %s763_s12, 4  ;;  %s27_s15 = sshll.u32 %s764_s14, 4  ;;  %s18_s13 = int_to_ptr.vmem [resolvable:$true] %s17_s13  ;;  %s28_s15 = int_to_ptr.vmem [resolvable:$true] %s27_s15 }
   0x4   :  { %s705_s16 = scalar_lea.vmem %s18_s13, 1024  ;;  %p710_p1 = scmp.lt.s32.totalorder %s18_s13, %s18_s13 }
   0x5   :  { %p706_p0 = scmp.ne.s32.totalorder %s18_s13, %s705_s16  ;;  %p711_p2 = scmp.lt.s32.totalorder %s705_s16, %s705_s16 }
   0x7   :  { %p712_p3 = por %p711_p2, %p710_p1 }
   0x9   :  { %p713_p4 = pnand %p712_p3, %p706_p0 }
   0xb   :  { %716 = shalt.err (!%p713_p4)
}
   0xc   :  { %20 = dma.hbm_to_vmem [thread:$0]  %s813_s0, 1024, %s18_s13, [#allocation3]  }
   0xd   :  { %s725_s19 = scalar_lea.vmem %s28_s15, 1024  ;;  %p730_p6 = scmp.lt.s32.totalorder %s28_s15, %s28_s15 }
   0xe   :  { %p726_p5 = scmp.ne.s32.totalorder %s28_s15, %s725_s19  ;;  %p731_p7 = scmp.lt.s32.totalorder %s725_s19, %s725_s19 }
  0x10   :  { %p732_p8 = por %p731_p7, %p730_p6 }
  0x12   :  { %p733_p9 = pnand %p732_p8, %p726_p5 }
  0x14   :  { %736 = shalt.err (!%p733_p9)
}
  0x15   :  { %30 = dma.hbm_to_vmem [thread:$0]  %s814_s1, 1024, %s28_s15, [#allocation6]  }
  0x16   :  { %757 = dma.done.wait [#allocation3], 1024  }
  0x17   :  { %758 = vsyncadd [#allocation3], 4294966272 }
  0x18   :  { %759 = dma.done.wait [#allocation6], 1024  }
  0x19   :  { %760 = vsyncadd [#allocation6], 4294966272  ;;  %v48_v0 = vld [vmem:[#allocation5 + $0x8] sm:$0xff]  ;;  %v47_v1 = vld [vmem:[#allocation5] sm:$0xff]  ;;  %vm342_vm0 = vcmask 64512   ;;  %v346_v30 = vlaneseq  ;;  %v765_v37 = vmov 0.0  }
  0x1a   :  { %v50_v2 = vld [vmem:[#allocation5 + $0x18] sm:$0xff]  ;;  %92 = vmatprep.subr.mxu0 %v48_v0  ;;  %v49_v3 = vld [vmem:[#allocation5 + $0x10] sm:$0xff]  ;;  %v40_v4 = vld [vmem:[#allocation2 + $0x8] sm:$0xff] }
  0x1b   :  { %162 = vmatprep.subr.mxu1 %v50_v2  ;;  %v39_v5 = vld [vmem:[#allocation2] sm:$0xff]  ;;  %93 = vmatpush1.xpose.msra.mxu0 %v47_v1  ;;  %v42_v6 = vld [vmem:[#allocation2 + $0x18] sm:$0xff]  ;;  %v52_v7 = vld [vmem:[#allocation5 + $0x28] sm:$0xff]  ;;  %v347_v31 = vand.u32 127, %v346_v30 }
  0x1c   :  { %163 = vmatpush1.xpose.msra.mxu1 %v49_v3  ;;  %v41_v8 = vld [vmem:[#allocation2 + $0x10] sm:$0xff]  ;;  %126 = vmatprep.mubr.f32.mxu0 %v40_v4  ;;  %v793_v9 = vld [vmem:[#allocation5 + $0x20] sm:$0xff]  ;;  %v54_v10 = vld [vmem:[#allocation5 + $0x38] sm:$0xff] }
  0x1d   :  { %196 = vmatprep.mubr.f32.mxu1 %v42_v6  ;;  %v795_v11 = vld [vmem:[#allocation5 + $0x30] sm:$0xff]  ;;  %232 = vmatprep.subr.mxu0 %v52_v7  ;;  %v44_v12 = vld [vmem:[#allocation2 + $0x28] sm:$0xff]  ;;  %v46_v13 = vld [vmem:[#allocation2 + $0x38] sm:$0xff] }
  0x1e   :  { %302 = vmatprep.subr.mxu1 %v54_v10  ;;  %127 = vmatmul.mubr.f32.vlgmr.msra.gmra.mxu0 %v39_v5  ;;  %v43_v14 = vld [vmem:[#allocation2 + $0x20] sm:$0xff]  ;;  %v45_v15 = vld [vmem:[#allocation2 + $0x30] sm:$0xff] }
  0x1f   :  { %197 = vmatmul.mubr.f32.vlgmr.msra.gmra.mxu1 %v41_v8  ;;  %233 = vmatpush1.xpose.msra.mxu0 %v793_v9  ;;  %v687_v16 = vld [vmem:[%s815_s2] ss:$0 sm:$0xff]  ;;  %s766_s2 = smov [#allocation7]  }
  0x20   :  { %303 = vmatpush1.xpose.msra.mxu1 %v795_v11  ;;  %266 = vmatprep.mubr.f32.mxu0 %v44_v12  ;;  %s677_s22 = sshll.u32 %s766_s2, 4  ;;  %s678_s22 = int_to_ptr.vmem [resolvable:$true] %s677_s22 }
  0x21   :  { %336 = vmatprep.mubr.f32.mxu1 %v46_v13  ;;  %401 = vmatprep.subr.mxu0 %v48_v0  ;;  %s737_s23 = scalar_lea.vmem %s678_s22, 1024  ;;  %p742_p11 = scmp.lt.s32.totalorder %s678_s22, %s678_s22 }
  0x22   :  { %472 = vmatprep.subr.mxu1 %v50_v2  ;;  %267 = vmatmul.mubr.f32.vlgmr.msra.gmra.mxu0 %v43_v14  ;;  %p738_p10 = scmp.ne.s32.totalorder %s678_s22, %s737_s23  ;;  %p743_p12 = scmp.lt.s32.totalorder %s737_s23, %s737_s23 }
  0x23   :  { %337 = vmatmul.mubr.f32.vlgmr.msra.gmra.mxu1 %v45_v15  ;;  %402 = vmatpush1.msra.mxu0 %v47_v1 }
  0x24   :  { %473 = vmatpush1.msra.mxu1 %v49_v3  ;;  %543 = vmatprep.subr.mxu0 %v52_v7  ;;  %p744_p13 = por %p743_p12, %p742_p11 }
  0x25   :  { %614 = vmatprep.subr.mxu1 %v54_v10  ;;  %435 = vmatprep.mubr.f32.mxu0 %v765_v37 }
  0x26   :  { %506 = vmatprep.mubr.f32.mxu1 %v765_v37  ;;  %p745_p0 = pnand %p744_p13, %p738_p10 }
  0xde   :  { %v128_v17 = vpop.f32.mrf.mxu0 }
  0xdf   :  { %v198_v18 = vpop.f32.mrf.mxu1  ;;  %v129_v19 = vadd.f32 %v687_v16, %v128_v17 }
  0xe0   :  { %v130_v20 = vpop.f32.mrf.mxu0 }
  0xe1   :  { %v200_v21 = vpop.f32.mrf.mxu1  ;;  %v199_v22 = vadd.f32 %v198_v18, %v129_v19 }
  0xe2   :  { %v268_v23 = vpop.f32.mrf.mxu0 }
  0xe3   :  { %v338_v24 = vpop.f32.mrf.mxu1  ;;  %v269_v25 = vadd.f32 %v268_v23, %v199_v22 }
  0xe4   :  { %v270_v26 = vpop.f32.mrf.mxu0 }
  0xe5   :  { %v340_v27 = vpop.f32.mrf.mxu1  ;;  %v339_v28 = vadd.f32 %v338_v24, %v269_v25 }
  0xe7   :  { %v343_v29 = vsel %vm342_vm0, %v339_v28, -inf }
  0xe8   :  { %344 = vmax.xlane.f32.xlu0 %v343_v29 }
 0x171   :  { %v345_v32 = vpop.xlane.xlu0 %344 }
 0x172   :  { %vm348_vm1 = vcmp.eq.f32.partialorder %v339_v28, %v345_v32 }
 0x173   :  { %v349_v33 = vsel %vm348_vm1, %v347_v31, 8 }
 0x174   :  { %v350_v34 = vsel %vm342_vm0, %v349_v33, 2147483647 }
 0x175   :  { %v352_v35 = vshra.s32 %v350_v34, 16  ;;  %v351_v38 = vand.u32 65535, %v350_v34 }
 0x177   :  { %v354_v36 = vcvt.s32.f32 %v352_v35  ;;  %v353_v40 = vcvt.s32.f32 %v351_v38 }
 0x179   :  { %355 = vmin.xlane.f32.xlu0 %v354_v36 }
 0x202   :  { %v356_v39 = vpop.xlane.xlu0 %355 }
 0x203   :  { %vm357_vm2 = vcmp.eq.f32.partialorder %v354_v36, %v356_v39  ;;  %v362_v42 = vcvt.f32.s32 %v356_v39 }
 0x204   :  { %v358_v41 = vsel %vm357_vm2, %v353_v40, inf }
 0x205   :  { %359 = vmin.xlane.f32.xlu1 %v358_v41  ;;  %v363_v44 = vshll.u32 %v362_v42, 16 }
 0x28e   :  { %v360_v43 = vpop.xlane.xlu1 %359 }
 0x28f   :  { %v361_v45 = vcvt.f32.s32 %v360_v43 }
 0x291   :  { %v364_v46 = vadd.s32 %v363_v44, %v361_v45 }
 0x293   :  { %vm365_vm3 = vcmp.eq.s32.totalorder %v347_v31, %v364_v46 }
 0x294   :  { %v688_v47 = vsel %vm365_vm3, 1.0, %v765_v37 }
 0x295   :  { %689 = vmatmul.mubr.msk.f32.vlgmr.msra.gmra.mxu0 %vm342_vm0, %v688_v47  ;;  %690 = vmatmul.mubr.msk.f32.vlgmr.msra.gmra.mxu1 %vm342_vm0, %v688_v47 }
 0x296   :  { %544 = vmatpush1.msra.mxu0 %v793_v9  ;;  %615 = vmatpush1.msra.mxu1 %v795_v11 }
 0x297   :  { %577 = vmatprep.mubr.f32.mxu0 %v765_v37  ;;  %648 = vmatprep.mubr.f32.mxu1 %v765_v37 }
 0x299   :  { %691 = vmatmul.mubr.msk.f32.vlgmr.msra.gmra.mxu0 %vm342_vm0, %v688_v47  ;;  %692 = vmatmul.mubr.msk.f32.vlgmr.msra.gmra.mxu1 %vm342_vm0, %v688_v47 }
 0x355   :  { %v437_v48 = vpop.f32.mrf.mxu0  ;;  %v508_v49 = vpop.f32.mrf.mxu1 }
 0x356   :  { %v655_v50 = vand.u32 2147483647, %v437_v48  ;;  %v657_v51 = vand.u32 2147483647, %v508_v49 }
 0x357   :  { %v439_v52 = vpop.f32.mrf.mxu0  ;;  %v510_v53 = vpop.f32.mrf.mxu1 }
 0x358   :  { %663 = vst [vmem:[#allocation7] sm:$0xff] %v655_v50  ;;  %665 = vst [vmem:[#allocation7 + $0x10] sm:$0xff] %v657_v51  ;;  %v656_v54 = vand.u32 2147483647, %v439_v52  ;;  %v658_v55 = vand.u32 2147483647, %v510_v53 }
 0x359   :  { %v579_v56 = vpop.f32.mrf.mxu0  ;;  %v650_v57 = vpop.f32.mrf.mxu1 }
 0x35a   :  { %664 = vst [vmem:[#allocation7 + $0x8] sm:$0xff] %v656_v54  ;;  %666 = vst [vmem:[#allocation7 + $0x18] sm:$0xff] %v658_v55  ;;  %v659_v58 = vand.u32 2147483647, %v579_v56  ;;  %v661_v59 = vand.u32 2147483647, %v650_v57 }
 0x35b   :  { %v581_v60 = vpop.f32.mrf.mxu0  ;;  %v652_v61 = vpop.f32.mrf.mxu1 }
 0x35c   :  { %667 = vst [vmem:[#allocation7 + $0x20] sm:$0xff] %v659_v58  ;;  %669 = vst [vmem:[#allocation7 + $0x30] sm:$0xff] %v661_v59  ;;  %v660_v62 = vand.u32 2147483647, %v581_v60  ;;  %v662_v63 = vand.u32 2147483647, %v652_v61 }
 0x35e   :  { %668 = vst [vmem:[#allocation7 + $0x28] sm:$0xff] %v660_v62  ;;  %670 = vst [vmem:[#allocation7 + $0x38] sm:$0xff] %v662_v63 }
 0x35f   :  { %748 = shalt.err (!%p745_p0)
}
 0x360   :  { %680 = dma.vmem_to_hbm [thread:$0]  %s678_s22, 1024, %s816_s3, [#allocation4]  }
 0x361   :  { %761 = dma.done.wait [#allocation4], 1024  }
 0x362   :  { %762 = vsyncadd [#allocation4], 4294966272 }
 0x363   :  { %684 = vsyncpa [#allocation3], 1 }
 0x364   :  { %685 = vsyncpa [#allocation6], 1 }
 0x365   :  { %686 = vsyncpa [#allocation4], 1 }

</bundles_post_ra>
